<compile_context>
chip_gen: v7x
topology: tpu7x:2x2x1
jax: 0.10.0
libtpu: 0.0.40
codegen_flags: <defaults>
</compile_context>

<pallas_src>
import functools
import math

import jax
import jax.numpy as jnp
from jax import lax
from jax.experimental import pallas as pl
from jax.experimental.pallas import tpu as pltpu


def _recall_kernel(logits_ref, tgt_ref, acc_ref, *, logit_threshold, n_valid,
                   tile_rows, tiles_per_split):
    """Accumulate per-split partial (tp, sum(target)) vectors into the resident output block.

    acc_ref block: (1, 2, 8, 128) f32 — [0,0] = tp partials, [0,1] = sum(target) partials.
    """
    c = pl.program_id(0)          # "parallel" split axis (second TensorCore on v7x)
    i = pl.program_id(1)          # "arbitrary" reduction axis

    @pl.when(i == 0)
    def _():
        acc_ref[...] = jnp.zeros_like(acc_ref)

    # Logical (unclamped) start row of this tile in the padded (rows, 128) view.
    row_start = (c * tiles_per_split + i) * tile_rows

    logits = logits_ref[...].astype(jnp.float32)
    target = tgt_ref[...].astype(jnp.float32)

    # Ragged-tail / phantom-block mask: an element is valid iff its global flat
    # index is < n. Padding values and edge-block garbage never reach the sums.
    ridx = lax.broadcasted_iota(jnp.int32, (tile_rows, 128), 0)
    lidx = lax.broadcasted_iota(jnp.int32, (tile_rows, 128), 1)
    gidx = (row_start + ridx) * 128 + lidx
    t = jnp.where(gidx < n_valid, target, 0.0)

    # sigmoid(x) > thr  <=>  x > logit(thr) (sigmoid monotone). Fused predicate:
    # no preds temporary, no multiply.
    tp_part = jnp.where(logits > logit_threshold, t, 0.0)

    # Lane-distributed VPU accumulation (vreg-aligned reshape, adds only); the
    # single cross-lane reduction is deferred to the wrapper.
    acc_ref[0, 0, :, :] += jnp.sum(tp_part.reshape(tile_rows // 8, 8, 128), axis=0)
    acc_ref[0, 1, :, :] += jnp.sum(t.reshape(tile_rows // 8, 8, 128), axis=0)


def recall_pallas(output, target, threshold=0.5, epsilon=1e-6, tile_rows=2048):
    """output: (N, 1) logits, target: (N, 1) 0/1 labels. Returns scalar recall."""
    # TODO(synk): multiclass branch (softmax + argmax) not implemented.
    assert output.shape[-1] == 1, "only the binary branch is implemented"
    assert 0.0 < threshold < 1.0
    assert tile_rows >= 8 and tile_rows % 8 == 0

    n = int(math.prod(output.shape))
    logit_threshold = math.log(threshold / (1.0 - threshold))

    # Lane-dense (rows, 128) view. The (N,1)->lane-dense relayout is one XLA copy we
    # cannot avoid given the caller contract; the tiny pad (to one 8*128 granule)
    # fuses into that same copy. Pad *values* never matter: the kernel masks by
    # global element index, so no exact-zero padding is required.
    pad_to = 8 * 128
    n_padded = pl.cdiv(n, pad_to) * pad_to
    rows = n_padded // 128

    def lane_dense(x):
        x = x.reshape(-1)
        if n_padded != n:
            x = jnp.pad(x, (0, n_padded - n))
        return x.reshape(rows, 128)

    out2d = lane_dense(output)   # native dtype: narrow (bf16/int8) inputs ship narrow
    tgt2d = lane_dense(target)

    # Big blocks amortize per-grid-step overhead; rows is a multiple of 8 so the
    # clamped tile size stays (8,128)-aligned.
    tile_rows = min(tile_rows, rows)
    total_tiles = pl.cdiv(rows, tile_rows)

    # Leading "parallel" axis of size 2: second TensorCore on v7x megacore; at most
    # one cheap fully-masked phantom tile on single-core chips.
    num_splits = 2
    tiles_per_split = pl.cdiv(total_tiles, num_splits)

    def in_index_map(c, i):
        # Clamp phantom blocks (logical index >= total_tiles) onto a valid block;
        # the kernel masks them out entirely via the unclamped global element index.
        return (jnp.minimum(c * tiles_per_split + i, total_tiles - 1), 0)

    kernel = functools.partial(
        _recall_kernel,
        logit_threshold=logit_threshold,
        n_valid=n,
        tile_rows=tile_rows,
        tiles_per_split=tiles_per_split,
    )

    partials = pl.pallas_call(
        kernel,
        out_shape=jax.ShapeDtypeStruct((num_splits, 2, 8, 128), jnp.float32),
        grid=(num_splits, tiles_per_split),
        in_specs=[
            pl.BlockSpec((tile_rows, 128), in_index_map),
            pl.BlockSpec((tile_rows, 128), in_index_map),
        ],
        out_specs=pl.BlockSpec((1, 2, 8, 128), lambda c, i: (c, 0, 0, 0)),
        compiler_params=pltpu.CompilerParams(
            dimension_semantics=("parallel", "arbitrary"),
        ),
        cost_estimate=pl.CostEstimate(
            flops=8 * n_padded,
            transcendentals=0,
            bytes_accessed=int(out2d.nbytes) + int(tgt2d.nbytes)
            + num_splits * 2 * 8 * 128 * 4,
        ),
    )(out2d, tgt2d)

    # Final scalar reduce of 2*2*8*128 partials is negligible in XLA.
    tp = jnp.sum(partials[:, 0])
    tp_plus_fn = jnp.sum(partials[:, 1])        # sum(target) == tp + fn exactly
    return tp / (tp_plus_fn + epsilon)


def _recall_reference(output, target, threshold=0.5, epsilon=1e-6):
    probs = jax.nn.sigmoid(output.astype(jnp.float32))
    preds = (probs > threshold).astype(jnp.float32)
    tgt = target.astype(jnp.float32)
    tp = jnp.sum(preds * tgt)
    fn = jnp.sum((1.0 - preds) * tgt)
    return tp / (tp + fn + epsilon)


if __name__ == "__main__":
    key = jax.random.PRNGKey(0)
    k1, k2, k3, k4 = jax.random.split(key, 4)

    # Case 1: ragged N (not a multiple of 128) -> exercises in-kernel tail masking.
    N1 = 1000
    out1 = jax.random.normal(k1, (N1, 1), dtype=jnp.float32)       # logits
    tgt1 = jax.random.bernoulli(k2, p=0.3, shape=(N1, 1)).astype(jnp.float32)
    rec1 = jax.block_until_ready(recall_pallas(out1, tgt1))
    ref1 = _recall_reference(out1, tgt1)
    assert jnp.allclose(rec1, ref1, atol=1e-6), (rec1, ref1)

    # Case 2: multi-tile with an odd tile count -> exercises the dual-split grid and
    # the clamped/masked phantom block, plus a non-default threshold.
    N2 = 5000
    out2 = jax.random.normal(k3, (N2, 1), dtype=jnp.float32)
    tgt2 = jax.random.bernoulli(k4, p=0.2, shape=(N2, 1)).astype(jnp.float32)
    rec2 = jax.block_until_ready(recall_pallas(out2, tgt2, threshold=0.3, tile_rows=8))
    ref2 = _recall_reference(out2, tgt2, threshold=0.3)
    assert jnp.allclose(rec2, ref2, atol=1e-6), (rec2, ref2)

    print("KERNEL_OK")
</pallas_src>

<mosaic_0001>
module attributes {stable_mosaic.version = 11 : i64} {
  func.func @_recall_kernel(%arg0: i32, %arg1: i32, %arg2: memref<8x128xf32, #tpu.memory_space<vmem>>, %arg3: memref<8x128xf32, #tpu.memory_space<vmem>>, %arg4: memref<1x2x8x128xf32, #tpu.memory_space<vmem>>) attributes {dimension_semantics = [#tpu.dimension_semantics<parallel>, #tpu.dimension_semantics<arbitrary>], iteration_bounds = array<i64: 2, 1>, scalar_prefetch = 0 : i64, scratch_operands = 0 : i64, tpu.core_type = #tpu.core_type<tc>, window_params = [{transform_indices = @transform_0, window_bounds = array<i64: 8, 128>}, {transform_indices = @transform_1, window_bounds = array<i64: 8, 128>}, {transform_indices = @transform_2, window_bounds = array<i64: 1, 2, 8, 128>}]} {
    %c0_i32 = arith.constant 0 : i32
    %0 = arith.cmpi eq, %arg1, %c0_i32 : i32
    %1 = arith.extui %0 : i1 to i32
    %c0_i32_0 = arith.constant 0 : i32
    %2 = arith.cmpi ne, %1, %c0_i32_0 : i32
    scf.if %2 {
      %cst_23 = arith.constant 0.000000e+00 : f32
      %39 = vector.broadcast %cst_23 : f32 to vector<1x2x8x128xf32>
      %c0_24 = arith.constant 0 : index
      %c0_25 = arith.constant 0 : index
      %c0_26 = arith.constant 0 : index
      %c0_27 = arith.constant 0 : index
      %40 = vector.load %arg4[%c0_24, %c0_25, %c0_26, %c0_27] : memref<1x2x8x128xf32, #tpu.memory_space<vmem>>, vector<1x2x8x128xf32>
      tpu.vector_store %arg4[%c0_24, %c0_25, %c0_26, %c0_27], %39 {strides = array<i32>} : memref<1x2x8x128xf32, #tpu.memory_space<vmem>>, vector<1x2x8x128xf32>,
    } else {
    }
    %c1_i32 = arith.constant 1 : i32
    %3 = arith.muli %arg0, %c1_i32 : i32
    %4 = arith.addi %3, %arg1 : i32
    %c8_i32 = arith.constant 8 : i32
    %5 = arith.muli %4, %c8_i32 : i32
    %c0 = arith.constant 0 : index
    %c0_1 = arith.constant 0 : index
    %6 = vector.load %arg2[%c0, %c0_1] : memref<8x128xf32, #tpu.memory_space<vmem>>, vector<8x128xf32>
    %c0_2 = arith.constant 0 : index
    %c0_3 = arith.constant 0 : index
    %7 = vector.load %arg3[%c0_2, %c0_3] : memref<8x128xf32, #tpu.memory_space<vmem>>, vector<8x128xf32>
    %8 = tpu.iota {dimensions = array<i32: 0>} : vector<8x128xi32>
    %9 = tpu.iota {dimensions = array<i32: 1>} : vector<8x128xi32>
    %10 = vector.broadcast %5 : i32 to vector<8x128xi32>
    %11 = arith.addi %10, %8 : vector<8x128xi32>
    %c128_i32 = arith.constant 128 : i32
    %12 = vector.broadcast %c128_i32 : i32 to vector<8x128xi32>
    %13 = arith.muli %11, %12 : vector<8x128xi32>
    %14 = arith.addi %13, %9 : vector<8x128xi32>
    %c1000_i32 = arith.constant 1000 : i32
    %15 = vector.broadcast %c1000_i32 : i32 to vector<8x128xi32>
    %16 = arith.cmpi slt, %14, %15 : vector<8x128xi32>
    %cst = arith.constant 0.000000e+00 : f32
    %17 = vector.broadcast %cst : f32 to vector<8x128xf32>
    %18 = arith.select %16, %7, %17 : vector<8x128xi1>, vector<8x128xf32>
    %cst_4 = arith.constant 0.000000e+00 : f32
    %19 = vector.broadcast %cst_4 : f32 to vector<8x128xf32>
    %20 = arith.cmpf ogt, %6, %19 : vector<8x128xf32>
    %cst_5 = arith.constant 0.000000e+00 : f32
    %21 = vector.broadcast %cst_5 : f32 to vector<8x128xf32>
    %22 = arith.select %20, %18, %21 : vector<8x128xi1>, vector<8x128xf32>
    %c0_6 = arith.constant 0 : index
    %c0_7 = arith.constant 0 : index
    %c0_8 = arith.constant 0 : index
    %c0_9 = arith.constant 0 : index
    %23 = vector.load %arg4[%c0_6, %c0_7, %c0_8, %c0_9] : memref<1x2x8x128xf32, #tpu.memory_space<vmem>>, vector<1x1x8x128xf32>
    %24 = vector.shape_cast %23 : vector<1x1x8x128xf32> to vector<8x128xf32>
    %25 = vector.shape_cast %22 : vector<8x128xf32> to vector<1x8x128xf32>
    %cst_10 = arith.constant dense<0.000000e+00> : vector<8x128xf32>
    %26 = vector.multi_reduction <add>, %25, %cst_10 [0] : vector<1x8x128xf32> to vector<8x128xf32>
    %27 = arith.addf %24, %26 : vector<8x128xf32>
    %c0_11 = arith.constant 0 : index
    %c0_12 = arith.constant 0 : index
    %c0_13 = arith.constant 0 : index
    %c0_14 = arith.constant 0 : index
    %28 = vector.load %arg4[%c0_11, %c0_12, %c0_13, %c0_14] : memref<1x2x8x128xf32, #tpu.memory_space<vmem>>, vector<1x1x8x128xf32>
    %29 = vector.shape_cast %28 : vector<1x1x8x128xf32> to vector<8x128xf32>
    %30 = vector.shape_cast %27 : vector<8x128xf32> to vector<1x1x8x128xf32>
    tpu.vector_store %arg4[%c0_11, %c0_12, %c0_13, %c0_14], %30 {strides = array<i32>} : memref<1x2x8x128xf32, #tpu.memory_space<vmem>>, vector<1x1x8x128xf32>,
    %c0_15 = arith.constant 0 : index
    %c1 = arith.constant 1 : index
    %c0_16 = arith.constant 0 : index
    %c0_17 = arith.constant 0 : index
    %31 = vector.load %arg4[%c0_15, %c1, %c0_16, %c0_17] : memref<1x2x8x128xf32, #tpu.memory_space<vmem>>, vector<1x1x8x128xf32>
    %32 = vector.shape_cast %31 : vector<1x1x8x128xf32> to vector<8x128xf32>
    %33 = vector.shape_cast %18 : vector<8x128xf32> to vector<1x8x128xf32>
    %cst_18 = arith.constant dense<0.000000e+00> : vector<8x128xf32>
    %34 = vector.multi_reduction <add>, %33, %cst_18 [0] : vector<1x8x128xf32> to vector<8x128xf32>
    %35 = arith.addf %32, %34 : vector<8x128xf32>
    %c0_19 = arith.constant 0 : index
    %c1_20 = arith.constant 1 : index
    %c0_21 = arith.constant 0 : index
    %c0_22 = arith.constant 0 : index
    %36 = vector.load %arg4[%c0_19, %c1_20, %c0_21, %c0_22] : memref<1x2x8x128xf32, #tpu.memory_space<vmem>>, vector<1x1x8x128xf32>
    %37 = vector.shape_cast %36 : vector<1x1x8x128xf32> to vector<8x128xf32>
    %38 = vector.shape_cast %35 : vector<8x128xf32> to vector<1x1x8x128xf32>
    tpu.vector_store %arg4[%c0_19, %c1_20, %c0_21, %c0_22], %38 {strides = array<i32>} : memref<1x2x8x128xf32, #tpu.memory_space<vmem>>, vector<1x1x8x128xf32>,
    return
  }
  func.func @transform_0(%arg0: i32, %arg1: i32) -> (i32, i32) {
    %c1_i32 = arith.constant 1 : i32
    %0 = arith.muli %arg0, %c1_i32 : i32
    %1 = arith.addi %0, %arg1 : i32
    %c0_i32 = arith.constant 0 : i32
    %2 = arith.minsi %1, %c0_i32 : i32
    %c0_i32_0 = arith.constant 0 : i32
    %c0_i32_1 = arith.constant 0 : i32
    return %2, %c0_i32_0 : i32, i32
  }
  func.func @transform_1(%arg0: i32, %arg1: i32) -> (i32, i32) {
    %c1_i32 = arith.constant 1 : i32
    %0 = arith.muli %arg0, %c1_i32 : i32
    %1 = arith.addi %0, %arg1 : i32
    %c0_i32 = arith.constant 0 : i32
    %2 = arith.minsi %1, %c0_i32 : i32
    %c0_i32_0 = arith.constant 0 : i32
    %c0_i32_1 = arith.constant 0 : i32
    return %2, %c0_i32_0 : i32, i32
  }
  func.func @transform_2(%arg0: i32, %arg1: i32) -> (i32, i32, i32, i32) {
    %c0_i32 = arith.constant 0 : i32
    %c0_i32_0 = arith.constant 0 : i32
    %c0_i32_1 = arith.constant 0 : i32
    %c0_i32_2 = arith.constant 0 : i32
    return %arg0, %c0_i32, %c0_i32_0, %c0_i32_1 : i32, i32, i32, i32
  }
}

</mosaic_0001>

<bundles_post_ra>
// kernel: tpu_custom_call.1
= control target key start
LH: loop header
LB: loop body
LE: loop exit
PB: predicated region body
PF: predicated region fallthrough
CT: control target
= control target key end

     0   :  { %7 = vsyncpa [#allocation3], 0  ;;  %s890_s0 = inlined_call_operand.hbm [shape: f32[8,128], index: 0, kind: input, shape index: {}]   ;;  %s891_s1 = inlined_call_operand.hbm [shape: f32[8,128], index: 1, kind: input, shape index: {}]   ;;  %s892_s2 = inlined_call_operand.hbm [shape: f32[2,2,8,128], index: 2, kind: output, shape index: {}]  }
   0x1   :  { %9 = vsyncpa [#allocation3 + $0x1], 0 }
   0x2   :  { %10 = vsyncpa [#allocation6], 0 }
   0x3   :  { %12 = vsyncpa [#allocation6 + $0x1], 0 }
   0x4   :  { %13 = vsyncpa [#allocation4], 0 }
   0x5   :  { %15 = vsyncpa [#allocation4 + $0x1], 0  ;;  %s685_s9 = smov 0   ;;  %s687_s10 = smov 0  }
   0x6   :  { %s689_s11 = smov 0   ;;  %s691_s12 = smov 0  }
   0x7   :  { %s693_s13 = smov 0   ;;  %s695_s14 = smov 0  }
   0x8   :  { %s697_s15 = smov 0   ;;  %s699_s16 = smov 0  }
   0x9 LB: > { %s381_s17 = sadd.s32 4294967295, %s663_s16   ;;  %s382_s18 = sadd.s32 4294967294, %s663_s16   ;;  %s663_s16 = sphi %s699_s16, %s21_s16   ;;  %s659_s15 = sphi %s697_s15, %s913_s15   ;;  %s655_s14 = sphi %s695_s14, %s912_s14   ;;  %s651_s13 = sphi %s693_s13, %s880_s13   ;;  %s647_s12 = sphi %s691_s12, %s911_s12   ;;  %s643_s11 = sphi %s689_s11, %s910_s11   ;;  %s639_s10 = sphi %s687_s10, %s909_s10   ;;  %s635_s9 = sphi %s685_s9, %s908_s9  }
   0xa   : > { %s33_s19 = sadd.s32 1, %s659_s15  ;;  %p632_p1 = scmp.ne.s32.totalorder %s651_s13, 0 }
   0xb   : > { %p35_p0 = scmp.ge.s32.totalorder %s33_s19, 2  ;;  %p54_p2 = scmp.eq.s32.totalorder %s663_s16, 0 }
   0xc   : > { %p59_p3 = scmp.ne.s32.totalorder %s651_s13, %s647_s12  ;;  %p60_p5 = scmp.eq.s32.totalorder %s381_s17, 0 }
   0xd   : > { %s915_s19 = smov (%p35_p0, %s33_s19), 0  ;;  %p731_p4 = por %p632_p1, %p54_p2 }
   0xe   : > { %p735_p6 = por %p60_p5, %p59_p3  ;;  %s101_s22 = ssub.s32 %s659_s15, %s915_s19 }
   0xf   : > { %p102_p7 = scmp.eq.s32.totalorder %s101_s22, 0  ;;  %s104_s23 = sadd.s32 1, %s643_s11 }
  0x10   : > { %s896_s21 = scalar_select %p735_p6, 1, 0 }
  0x11   : > { %s743_s24 = scalar_select %p102_p7, %s643_s11, %s104_s23  }
  0x12   : > { %p114_p8 = scmp.ne.s32.totalorder %s643_s11, %s639_s10  ;;  %p115_p9 = scmp.eq.s32.totalorder %s381_s17, 1 }
  0x13   : > { %p120_p10 = scmp.ne.s32.totalorder %s639_s10, %s635_s9  ;;  %p121_p11 = scmp.eq.s32.totalorder %s382_s18, 1 }
  0x14   : > { %p749_p12 = por %p115_p9, %p114_p8  ;;  %p419_p1 = scmp.lt.s32.totalorder %s663_s16, 2 }
  0x15   : > { %p754_p0 = por %p121_p11, %p120_p10  ;;  %s665_s27 = smov [#allocation2]  }
  0x16   : > { %s897_s25 = scalar_select %p749_p12, 1, 0 }
  0x17   : > { %s898_s26 = scalar_select %p754_p0, 1, 0 }
  0x18   : > { %s155_s28 = sshll.u32 %s665_s27, 4  ;;  %p761_p2 = pnand %p419_p1, %p731_p4  ;;  %s156_s28 = int_to_ptr.vmem [resolvable:$true] %s155_s28 }
  0x19   : > { %s496_s4 = scalar_lea.hbm %s890_s0, 128 }
  0x1a   : > { %p497_p7 = scmp.ne.s32.totalorder %s890_s0, %s496_s4  ;;  %p498_p8 = pneg %p761_p2 }
  0x1b   : > { %p503_p10 = scmp.lt.u32.totalorder %s496_s4, %s496_s4  ;;  %p505_p11 = scmp.lt.u32.totalorder %s496_s4, %s890_s0 }
  0x1c   : > { %p499_p4 = pnand %p498_p8, %p497_p7 }
  0x1d   : > { %p506_p1 = por %p505_p11, %p503_p10 }
  0x1e   : > { %p500_p9 = pneg %p499_p4 }
  0x20   : > { %p507_p13 = pnand %p506_p1, %p500_p9 }
  0x22   : > { %510 = shalt.err (!%p507_p13)
}
  0x23   : > { %s511_s12 = scalar_lea.vmem %s156_s28, 128  ;;  %s518_s17 = scalar_lea.vmem %s156_s28, 256 }
  0x24   : > { %p512_p3 = scmp.ne.s32.totalorder %s156_s28, %s511_s12  ;;  %p519_p12 = scmp.lt.s32.totalorder %s156_s28, %s156_s28 }
  0x25   : > { %p520_p6 = scmp.lt.s32.totalorder %s518_s17, %s511_s12 }
  0x26   : > { %p514_p5 = pnand %p512_p3, %p498_p8 }
  0x27   : > { %p521_p7 = por %p520_p6, %p519_p12 }
  0x28   : > { %p515_p0 = pneg %p514_p5 }
  0x2a   : > { %p522_p4 = pnand %p521_p7, %p515_p0 }
  0x2c   : > { %525 = shalt.err (!%p522_p4)
}
  0x2d   : > { %411 = dma.hbm_to_vmem [thread:$0]  (!%p761_p2), %s890_s0, 128, %s156_s28, [#allocation3]  }
  0x2e   : > { %p900_p13 = scmp.lt.s32.totalorder %s663_s16, 3  ;;  %p901_p9 = scmp.ge.s32.totalorder %s663_s16, 1 }
  0x2f   : > { %s666_s23 = smov [#allocation5]   ;;  %s526_s4 = scalar_lea.hbm %s891_s1, 128 }
  0x30   : > { %p793_p10 = pnand %p901_p9, %p900_p13  ;;  %s176_s27 = sshll.u32 %s666_s23, 4  ;;  %s177_s27 = int_to_ptr.vmem [resolvable:$true] %s176_s27 }
  0x31   : > { %p527_p6 = scmp.ne.s32.totalorder %s891_s1, %s526_s4  ;;  %p533_p3 = scmp.lt.u32.totalorder %s526_s4, %s526_s4 }
  0x32   : > { %s902_s22 = scalar_select %p793_p10, 1, 0 }
  0x33   : > { %p529_p12 = pnand %p527_p6, %p498_p8  ;;  %p535_p5 = scmp.lt.u32.totalorder %s526_s4, %s891_s1 }
  0x35   : > { %p530_p0 = pneg %p529_p12  ;;  %p536_p11 = por %p535_p5, %p533_p3 }
  0x37   : > { %p537_p1 = pnand %p536_p11, %p530_p0 }
  0x39   : > { %540 = shalt.err (!%p537_p1)
}
  0x3a   : > { %s541_s8 = scalar_lea.vmem %s177_s27, 128  ;;  %s548_s12 = scalar_lea.vmem %s177_s27, 256 }
  0x3b   : > { %p542_p7 = scmp.ne.s32.totalorder %s177_s27, %s541_s8  ;;  %p549_p9 = scmp.lt.s32.totalorder %s177_s27, %s177_s27 }
  0x3c   : > { %p550_p10 = scmp.lt.s32.totalorder %s548_s12, %s541_s8 }
  0x3d   : > { %p544_p4 = pnand %p542_p7, %p498_p8 }
  0x3e   : > { %p551_p6 = por %p550_p10, %p549_p9 }
  0x3f   : > { %p545_p13 = pneg %p544_p4 }
  0x41   : > { %p552_p12 = pnand %p551_p6, %p545_p13 }
  0x43   : > { %555 = shalt.err (!%p552_p12)
}
  0x44   : > { %414 = dma.hbm_to_vmem [thread:$0]  (!%p761_p2), %s891_s1, 128, %s177_s27, [#allocation6]  }
  0x45   : > { %p903_p0 = scmp.ne.s32.totalorder %s902_s22, 0 }
  0x46   : > { %s187_s20 = sand.u32 (!%p903_p0), 1, %s651_s13   ;;  %p904_p8 = scmp.ne.s32.totalorder (!%p903_p0), %s896_s21, 0 }
  0x47   : > { %185 = sbr.rel (%p903_p0) target bundleno = 109 (0x6d), region = 28  ;;  %s390_s23 = sshll.u32 (!%p903_p0), %s187_s20, 3 }
  0x48   : > { %s188_s30 = scalar_lea.sflag (!%p903_p0), [#allocation3], %s187_s20  ;;  %s191_s3 = scalar_lea.vmem (!%p903_p0), [#allocation2], %s390_s23 }
  0x4e   : > { %621 = dma.done.wait (%p904_p8), %s188_s30, 128  }
  0x4f   : > { %623 = vsyncadd (%p904_p8), %s188_s30, 4294967168  ;;  %s197_s29 = scalar_lea.sflag [#allocation6], %s187_s20  ;;  %s200_s4 = scalar_lea.vmem [#allocation5], %s390_s23 }
  0x50   : > { %625 = dma.done.wait (%p904_p8), %s197_s29, 128  }
  0x51   : > { %627 = vsyncadd (%p904_p8), %s197_s29, 4294967168  ;;  %s223_s22 = sand.u32 1, %s639_s10   ;;  %s393_s27 = sshll.u32 %s655_s14, 3  ;;  %v242_v0 = vlaneseq  ;;  %v240_v6 = vld [vmem:[%s191_s3] sm:$0xff]  ;;  %v241_v7 = vld [vmem:[%s200_s4] sm:$0xff] }
  0x52   : > { %v246_v1 = vstv %s393_s27  ;;  %s392_s5 = sshll.u32 %s223_s22, 4  ;;  %vm252_vm0 = vcmp.gt.f32.partialorder %v240_v6, 0.0  ;;  %s401_s6 = sshll.u32 %s655_s14, 8 }
  0x53   : > { %v243_v2 = vshrl.u32 %v242_v0, 7  ;;  %v245_v3 = vand.u32 127, %v242_v0  ;;  %s225_s21 = scalar_lea.vmem [#allocation7], %s392_s5  ;;  %s834_s12 = scalar_lea.hbm %s892_s2, %s401_s6 }
  0x54   : > { %s277_s28 = sshll.u32 %s225_s21, 4  ;;  %s838_s17 = scalar_lea.sflag [#allocation4], %s223_s22  ;;  %s836_s28 = int_to_ptr.vmem [resolvable:$true] %s277_s28 }
  0x55   : > { %v247_v4 = vadd.s32 %v246_v1, %v243_v2  ;;  %s556_s14 = scalar_lea.vmem %s836_s28, 256  ;;  %p905_p10 = scmp.ne.s32.totalorder %s897_s25, 0 }
  0x56   : > { %p557_p2 = scmp.ne.s32.totalorder %s836_s28, %s556_s14  ;;  %s667_s18 = smov [#allocation7]  }
  0x57   : > { %v248_v5 = vmul.u32 128, %v247_v4  ;;  %s560_s20 = sshll.u32 %s667_s18, 4  ;;  %s561_s20 = int_to_ptr.vmem [resolvable:$false] %s560_s20 }
  0x58   : > { %p558_p3 = pnand %p557_p2, %p905_p10  ;;  %s562_s23 = scalar_lea.vmem %s561_s20, 512 }
  0x59   : > { %v249_v8 = vadd.s32 %v248_v5, %v245_v3  ;;  %p563_p11 = scmp.lt.s32.totalorder %s836_s28, %s561_s20  ;;  %p564_p1 = scmp.lt.s32.totalorder %s562_s23, %s556_s14 }
  0x5a   : > { %p559_p5 = pneg %p558_p3 }
  0x5b   : > { %vm250_vm1 = vcmp.lt.s32.totalorder %v249_v8, 1000  ;;  %p565_p7 = por %p564_p1, %p563_p11 }
  0x5c   : > { %v251_v9 = vsel %vm250_vm1, %v241_v7, 0.0 }
  0x5d   : > { %v253_v10 = vsel %vm252_vm0, %v251_v9, 0.0  ;;  %395 = vst [vmem:[%s225_s21 + $0x8] sm:$0xff] %v251_v9  ;;  %p566_p4 = pnand %p565_p7, %p559_p5 }
  0x5e   : > { %257 = vst [vmem:[%s225_s21] sm:$0xff] %v253_v10 }
  0x5f   : > { %569 = shalt.err (!%p566_p4)
}
  0x60   : > { %s570_s30 = scalar_lea.hbm %s834_s12, 256  ;;  %s574_s4 = scalar_lea.hbm %s892_s2, 512 }
  0x61   : > { %p571_p13 = scmp.ne.s32.totalorder %s834_s12, %s570_s30  ;;  %p575_p12 = scmp.lt.u32.totalorder %s834_s12, %s892_s2 }
  0x62   : > { %p576_p0 = scmp.lt.u32.totalorder %s574_s4, %s570_s30  ;;  %p578_p2 = scmp.lt.u32.totalorder %s570_s30, %s834_s12 }
  0x63   : > { %p572_p9 = pnand %p571_p13, %p905_p10 }
  0x64   : > { %p577_p8 = por %p576_p0, %p575_p12 }
  0x65   : > { %p573_p6 = pneg %p572_p9 }
  0x66   : > { %p579_p3 = por %p578_p2, %p577_p8 }
  0x68   : > { %p580_p5 = pnand %p579_p3, %p573_p6 }
  0x6a   : > { %583 = shalt.err (!%p580_p5)
}
  0x6b   : > { %s668_s5 = smov 128   ;;  %s669_s6 = smov 8  }
  0x6c   : > { %406 = dma.vmem_to_hbm [thread:$0]  (%p905_p10), %s836_s28, 256, %s834_s12, %s838_s17, %s668_s5, %s668_s5, %s669_s6  }
  0x6d PF: > { %s292_s21 = sand.u32 1, %s635_s9   ;;  %p906_p11 = scmp.ne.s32.totalorder %s898_s26, 0 }
  0x6e   : > { %p907_p1 = scmp.ge.s32.totalorder %s663_s16, 2  ;;  %s293_s7 = scalar_lea.sflag [#allocation4], %s292_s21 }
  0x70   : > { %p416_p7 = pnand %p907_p1, %p906_p11 }
  0x72   : > { %629 = dma.done.wait (!%p416_p7), %s293_s7, 256  }
  0x73   : > { %631 = vsyncadd (!%p416_p7), %s293_s7, 4294967040  ;;  %s21_s16 = sadd.s32 1, %s663_s16   ;;  %s908_s9 = smov %s639_s10 }
  0x74   : > { %p18_p4 = scmp.ge.s32.totalorder %s21_s16, 4   ;;  %s909_s10 = smov %s643_s11 }
  0x75   : > { %s910_s11 = smov %s743_s24  ;;  %s911_s12 = smov %s651_s13 }
  0x76   : > { %s880_s13 = smov 0   ;;  %s912_s14 = smov %s659_s15 }
  0x77   : > { %s913_s15 = smov %s915_s19  ;;  %20 = sbr.rel (!%p18_p4) target bundleno = 9 (0x9), region = 91 }
  0x7e   :  { %298 = vsyncpa [#allocation3], 1 }
  0x7f   :  { %300 = vsyncpa [#allocation3 + $0x1], 1 }
  0x80   :  { %301 = vsyncpa [#allocation6], 1 }
  0x81   :  { %303 = vsyncpa [#allocation6 + $0x1], 1 }
  0x82   :  { %304 = vsyncpa [#allocation4], 1 }
  0x83   :  { %306 = vsyncpa [#allocation4 + $0x1], 1 }

</bundles_post_ra>
